<compile_context>
chip_gen: v7x
topology: tpu7x:2x2x1
jax: 0.10.0
libtpu: 0.0.40
codegen_flags: <defaults>
</compile_context>

<pallas_src>
import math

import jax
import jax.numpy as jnp
from jax.experimental import pallas as pl
from jax.experimental.pallas import tpu as pltpu

# Model hyperparameters (from TDNN.__init__)
IN_CH = 4          # input_channels
K1, C1 = 3, 8      # conv1: Conv1d(IN_CH, 8, 3)
K2, C2 = 5, 3      # conv2: Conv1d(8, 3, 5)
K3, C3 = 9, 3      # conv3: Conv1d(3, 3, 9)

CH_PAD = 8                                 # channel dims padded to 8 sublanes
LANE_PAD = 128                             # zero halo appended in the scratch
SHRINK = (K1 - 1) + (K2 - 1) + (K3 - 1)    # 14 positions lost to the valid convs


def _round_up(x, m):
    return (x + m - 1) // m * m


def _plan_blocks(B, L, max_lanes=8 * 1024):
    """Pick TB (examples per grid step) so TB*L is a lane-dense multiple of 128.

    nb is capped at ~8k lanes: big enough that the ~0.35us per-step overhead
    is negligible, small enough that v5e's 16 MiB default scoped VMEM and
    v7x's 64 MiB physical VMEM are never at risk, and multiple grid steps are
    available for pipeline overlap / v7x megacore whenever B allows.
    """
    tb0 = 128 // math.gcd(L, 128)          # smallest TB with (TB * L) % 128 == 0
    b_ceil = _round_up(B, tb0)
    tb_cap = max(tb0, b_ceil // 2)         # prefer >= 2 grid steps
    tb = tb0
    while tb * 2 * L <= max_lanes and tb * 2 <= tb_cap:
        tb *= 2
    # If tb0 * L alone already exceeds max_lanes we accept the single big block
    # (bf16 scratches keep the footprint modest); see TODO(synk) above.
    b_pad = _round_up(B, tb)               # pad batch with zero examples if needed
    return tb, b_pad // tb, b_pad          # TB, grid size, padded batch


def tdnn_kernel(x_ref, w1_ref, b1_ref, w2_ref, b2_ref, w3_ref, b3_ref, o_ref,
                h_halo, stack):
    nb = o_ref.shape[-1]                       # lanes per block (multiple of 128)

    # Fresh zero halo and zero rows for the 4 padded layer-1 channels, then
    # drop the 4 real bf16 input channels into the top rows.
    h_halo[...] = jnp.zeros_like(h_halo)
    h_halo[:IN_CH, :nb] = x_ref[...]

    def conv_sigmoid(w_ref, b_ref, k_taps):
        # Stack the k_taps lane-shifted activation slices along sublanes so the
        # whole layer is ONE MXU matmul with a (k_taps*8)-deep contraction.
        # Reads are static-offset slices of the halo scratch ref (in-bounds:
        # k <= 8 < LANE_PAD); writes land at sublane offsets that are multiples
        # of 8.
        for k in range(k_taps):                # static unroll; K in {3, 5, 9}
            stack[k * CH_PAD:(k + 1) * CH_PAD, :] = h_halo[:, k:k + nb]
        acc = jnp.dot(w_ref[...], stack[:k_taps * CH_PAD, :],
                      preferred_element_type=jnp.float32)      # (8, nb) f32
        z = acc + b_ref[...]                   # (8, 1) f32 bias broadcasts
        return 0.5 * (1.0 + jnp.tanh(0.5 * z))  # sigmoid via a single EUP tanh

    # Layer outputs are written back (bf16) into the same halo scratch; the
    # halo lanes stay zero because every write targets [:, :nb] only.  Padded
    # output channels of layer 2 hold sigmoid(0)=0.5 but are neutralized by
    # the zero-padded weight columns of layer 3.
    h_halo[:, :nb] = conv_sigmoid(w1_ref, b1_ref, K1).astype(jnp.bfloat16)
    h_halo[:, :nb] = conv_sigmoid(w2_ref, b2_ref, K2).astype(jnp.bfloat16)
    o_ref[...] = conv_sigmoid(w3_ref, b3_ref, K3)[:C3, :]


def _pack_weights(w, b):
    """(C_out, C_in, K) -> (8, K*8) bf16 slab with column k*8 + c_in = w[o, c_in, k].

    Matches the stacked-operand row order (tap-major, channel-minor).  Padded
    rows/columns are zero.  Bias -> (8, 1) f32.
    """
    c_out, c_in, k_taps = w.shape
    wt = jnp.transpose(w.astype(jnp.float32), (2, 0, 1))            # (K, C_out, C_in)
    wt = jnp.pad(wt, ((0, 0), (0, CH_PAD - c_out), (0, CH_PAD - c_in)))
    wt = jnp.transpose(wt, (1, 0, 2)).reshape(CH_PAD, k_taps * CH_PAD)
    bp = jnp.pad(b.astype(jnp.float32), (0, CH_PAD - c_out)).reshape(CH_PAD, 1)
    return wt.astype(jnp.bfloat16), bp


def tdnn_forward(x, params):
    """x: (B, IN_CH, L) float32. Returns (B, 3, L - 14) float32."""
    w1, b1, w2, b2, w3, b3 = params
    B, C, L = x.shape
    assert C == IN_CH
    L_out = L - SHRINK
    assert L_out >= 1, "sequence too short for the three valid convolutions"

    TB, grid, b_pad = _plan_blocks(B, L)
    nb = TB * L                              # lanes per block (multiple of 128)
    n_tot = b_pad * L

    # Single fused relayout: (B, C, L) f32 -> (C, b_pad*L) bf16; channels stay
    # at their real count (4), only the batch is zero-padded.
    xt = jnp.transpose(x.astype(jnp.bfloat16), (1, 0, 2))            # (C, B, L)
    xt = jnp.pad(xt, ((0, 0), (0, b_pad - B), (0, 0))).reshape(IN_CH, n_tot)

    w1p, b1p = _pack_weights(w1, b1)
    w2p, b2p = _pack_weights(w2, b2)
    w3p, b3p = _pack_weights(w3, b3)

    flops = 2 * B * L * (C1 * IN_CH * K1 + C2 * C1 * K2 + C3 * C2 * K3)
    transcendentals = B * L * (C1 + C2 + C3)
    bytes_accessed = (2 * IN_CH * n_tot                 # bf16 input read
                      + 4 * C3 * n_tot                  # f32 output write
                      + 2 * (w1p.size + w2p.size + w3p.size)
                      + 4 * 3 * CH_PAD)

    out_flat = pl.pallas_call(
        tdnn_kernel,
        out_shape=jax.ShapeDtypeStruct((C3, n_tot), jnp.float32),
        grid_spec=pltpu.PrefetchScalarGridSpec(
            num_scalar_prefetch=0,
            grid=(grid,),
            in_specs=[
                pl.BlockSpec((IN_CH, nb), lambda g: (0, g)),   # 4 = full dim
                pl.BlockSpec(w1p.shape, lambda g: (0, 0)),
                pl.BlockSpec(b1p.shape, lambda g: (0, 0)),
                pl.BlockSpec(w2p.shape, lambda g: (0, 0)),
                pl.BlockSpec(b2p.shape, lambda g: (0, 0)),
                pl.BlockSpec(w3p.shape, lambda g: (0, 0)),
                pl.BlockSpec(b3p.shape, lambda g: (0, 0)),
            ],
            out_specs=pl.BlockSpec((C3, nb), lambda g: (0, g)),  # 3 = full dim
            scratch_shapes=[
                pltpu.VMEM((CH_PAD, nb + LANE_PAD), jnp.bfloat16),   # halo act
                pltpu.VMEM((K3 * CH_PAD, nb), jnp.bfloat16),         # stacked op
            ],
        ),
        compiler_params=pltpu.CompilerParams(
            dimension_semantics=("parallel",),
            vmem_limit_bytes=32 * 1024 * 1024),
        cost_estimate=pl.CostEstimate(flops=flops,
                                      transcendentals=transcendentals,
                                      bytes_accessed=bytes_accessed),
    )(xt, w1p, b1p, w2p, b2p, w3p, b3p)

    # Drop batch padding and per-example garbage tails; channels already real.
    out = out_flat.reshape(C3, b_pad, L)[:, :B, :L_out]
    return jnp.transpose(out, (1, 0, 2))                  # (B, C3, L_out)


def init_params(key):
    """Deterministic init mirroring PyTorch Conv1d default (uniform +-1/sqrt(fan_in))."""
    ks = jax.random.split(key, 6)

    def u(k, shape, fan_in):
        bound = 1.0 / jnp.sqrt(fan_in)
        return jax.random.uniform(k, shape, jnp.float32, -bound, bound)

    w1 = u(ks[0], (C1, IN_CH, K1), IN_CH * K1)
    b1 = u(ks[1], (C1,), IN_CH * K1)
    w2 = u(ks[2], (C2, C1, K2), C1 * K2)
    b2 = u(ks[3], (C2,), C1 * K2)
    w3 = u(ks[4], (C3, C2, K3), C2 * K3)
    b3 = u(ks[5], (C3,), C2 * K3)
    return (w1, b1, w2, b2, w3, b3)


def tdnn_reference(x, params):
    """Pure-JAX f32 reference (same semantics as the PyTorch forward)."""
    w1, b1, w2, b2, w3, b3 = params

    def conv_sig(x, w, b):
        c_out, _, k_taps = w.shape
        l_out = x.shape[-1] - k_taps + 1
        acc = jnp.zeros(x.shape[:-2] + (c_out, l_out), jnp.float32)
        for k in range(k_taps):
            acc = acc + jnp.einsum('oc,...cl->...ol', w[:, :, k],
                                   x[..., :, k:k + l_out])
        return jax.nn.sigmoid(acc + b[:, None])

    h = conv_sig(x, w1, b1)
    h = conv_sig(h, w2, b2)
    h = conv_sig(h, w3, b3)
    return h


if __name__ == "__main__":
    key = jax.random.PRNGKey(0)
    kp, kx = jax.random.split(key)
    params = init_params(kp)

    B, L = 2, 32                           # small shapes; L_out = 32 - 14 = 18
    x = jax.random.normal(kx, (B, IN_CH, L), jnp.float32)

    fwd = jax.jit(tdnn_forward)
    out = jax.block_until_ready(fwd(x, params))

    ref = tdnn_reference(x, params)
    assert out.shape == (B, C3, L - SHRINK), out.shape
    # bf16 MXU operands with f32 accumulation + tanh-form sigmoid: allow a few
    # e-3 of quantization error against the pure-f32 reference.
    err = float(jnp.max(jnp.abs(out - ref)))
    assert err < 3e-2, f"max abs error vs f32 reference: {err}"

    print("KERNEL_OK")
</pallas_src>

<mosaic_0001>
module attributes {stable_mosaic.version = 11 : i64} {
  func.func @tdnn_kernel(%arg0: i32, %arg1: memref<4x128xbf16, #tpu.memory_space<vmem>>, %arg2: memref<8x24xbf16, #tpu.memory_space<vmem>>, %arg3: memref<8x1xf32, #tpu.memory_space<vmem>>, %arg4: memref<8x40xbf16, #tpu.memory_space<vmem>>, %arg5: memref<8x1xf32, #tpu.memory_space<vmem>>, %arg6: memref<8x72xbf16, #tpu.memory_space<vmem>>, %arg7: memref<8x1xf32, #tpu.memory_space<vmem>>, %arg8: memref<3x128xf32, #tpu.memory_space<vmem>>, %arg9: memref<8x256xbf16, #tpu.memory_space<vmem>>, %arg10: memref<72x128xbf16, #tpu.memory_space<vmem>>) attributes {dimension_semantics = [#tpu.dimension_semantics<parallel>], iteration_bounds = array<i64: 1>, scalar_prefetch = 0 : i64, scratch_operands = 2 : i64, tpu.core_type = #tpu.core_type<tc>, window_params = [{transform_indices = @transform_0, window_bounds = array<i64: 4, 128>}, {pipeline_mode = #tpu.pipeline_mode<synchronous>, transform_indices = @transform_1, window_bounds = array<i64: 8, 24>}, {pipeline_mode = #tpu.pipeline_mode<synchronous>, transform_indices = @transform_2, window_bounds = array<i64: 8, 1>}, {pipeline_mode = #tpu.pipeline_mode<synchronous>, transform_indices = @transform_3, window_bounds = array<i64: 8, 40>}, {pipeline_mode = #tpu.pipeline_mode<synchronous>, transform_indices = @transform_4, window_bounds = array<i64: 8, 1>}, {pipeline_mode = #tpu.pipeline_mode<synchronous>, transform_indices = @transform_5, window_bounds = array<i64: 8, 72>}, {pipeline_mode = #tpu.pipeline_mode<synchronous>, transform_indices = @transform_6, window_bounds = array<i64: 8, 1>}, {transform_indices = @transform_7, window_bounds = array<i64: 3, 128>}]} {
    %cst = arith.constant 0.000000e+00 : bf16
    %0 = vector.broadcast %cst : bf16 to vector<8x256xbf16>
    %c0 = arith.constant 0 : index
    %c0_0 = arith.constant 0 : index
    %1 = vector.load %arg9[%c0, %c0_0] : memref<8x256xbf16, #tpu.memory_space<vmem>>, vector<8x256xbf16>
    tpu.vector_store %arg9[%c0, %c0_0], %0 {strides = array<i32>} : memref<8x256xbf16, #tpu.memory_space<vmem>>, vector<8x256xbf16>,
    %c0_1 = arith.constant 0 : index
    %c0_2 = arith.constant 0 : index
    %2 = vector.load %arg1[%c0_1, %c0_2] : memref<4x128xbf16, #tpu.memory_space<vmem>>, vector<4x128xbf16>
    %c0_3 = arith.constant 0 : index
    %c0_4 = arith.constant 0 : index
    %3 = vector.load %arg9[%c0_3, %c0_4] : memref<8x256xbf16, #tpu.memory_space<vmem>>, vector<4x128xbf16>
    tpu.vector_store %arg9[%c0_3, %c0_4], %2 {strides = array<i32>} : memref<8x256xbf16, #tpu.memory_space<vmem>>, vector<4x128xbf16>,
    %c0_5 = arith.constant 0 : index
    %c0_6 = arith.constant 0 : index
    %4 = vector.load %arg9[%c0_5, %c0_6] : memref<8x256xbf16, #tpu.memory_space<vmem>>, vector<8x128xbf16>
    %c0_7 = arith.constant 0 : index
    %c0_8 = arith.constant 0 : index
    %5 = vector.load %arg10[%c0_7, %c0_8] : memref<72x128xbf16, #tpu.memory_space<vmem>>, vector<8x128xbf16>
    tpu.vector_store %arg10[%c0_7, %c0_8], %4 {strides = array<i32>} : memref<72x128xbf16, #tpu.memory_space<vmem>>, vector<8x128xbf16>,
    %c0_9 = arith.constant 0 : index
    %c1 = arith.constant 1 : index
    %6 = vector.load %arg9[%c0_9, %c1] : memref<8x256xbf16, #tpu.memory_space<vmem>>, vector<8x128xbf16>
    %c8 = arith.constant 8 : index
    %c0_10 = arith.constant 0 : index
    %7 = vector.load %arg10[%c8, %c0_10] : memref<72x128xbf16, #tpu.memory_space<vmem>>, vector<8x128xbf16>
    tpu.vector_store %arg10[%c8, %c0_10], %6 {strides = array<i32>} : memref<72x128xbf16, #tpu.memory_space<vmem>>, vector<8x128xbf16>,
    %c0_11 = arith.constant 0 : index
    %c2 = arith.constant 2 : index
    %8 = vector.load %arg9[%c0_11, %c2] : memref<8x256xbf16, #tpu.memory_space<vmem>>, vector<8x128xbf16>
    %c16 = arith.constant 16 : index
    %c0_12 = arith.constant 0 : index
    %9 = vector.load %arg10[%c16, %c0_12] : memref<72x128xbf16, #tpu.memory_space<vmem>>, vector<8x128xbf16>
    tpu.vector_store %arg10[%c16, %c0_12], %8 {strides = array<i32>} : memref<72x128xbf16, #tpu.memory_space<vmem>>, vector<8x128xbf16>,
    %c0_13 = arith.constant 0 : index
    %c0_14 = arith.constant 0 : index
    %10 = vector.load %arg2[%c0_13, %c0_14] : memref<8x24xbf16, #tpu.memory_space<vmem>>, vector<8x24xbf16>
    %c0_15 = arith.constant 0 : index
    %c0_16 = arith.constant 0 : index
    %11 = vector.load %arg10[%c0_15, %c0_16] : memref<72x128xbf16, #tpu.memory_space<vmem>>, vector<24x128xbf16>
    %cst_17 = arith.constant dense<0.000000e+00> : vector<8x128xf32>
    %12 = tpu.matmul %10, %11, %cst_17 {dimension_numbers = #tpu.dot_dimension_numbers<[1], [0], [0], [1], [0, 0, 1, 1], [], []>} : vector<8x24xbf16>, vector<24x128xbf16>, vector<8x128xf32> -> vector<8x128xf32>
    %c0_18 = arith.constant 0 : index
    %c0_19 = arith.constant 0 : index
    %13 = vector.load %arg3[%c0_18, %c0_19] : memref<8x1xf32, #tpu.memory_space<vmem>>, vector<8x1xf32>
    %14 = vector.broadcast %13 : vector<8x1xf32> to vector<8x128xf32>
    %15 = arith.addf %12, %14 : vector<8x128xf32>
    %cst_20 = arith.constant 5.000000e-01 : f32
    %16 = vector.broadcast %cst_20 : f32 to vector<8x128xf32>
    %17 = arith.mulf %16, %15 : vector<8x128xf32>
    %18 = math.tanh %17 : vector<8x128xf32>
    %cst_21 = arith.constant 1.000000e+00 : f32
    %19 = vector.broadcast %cst_21 : f32 to vector<8x128xf32>
    %20 = arith.addf %19, %18 : vector<8x128xf32>
    %cst_22 = arith.constant 5.000000e-01 : f32
    %21 = vector.broadcast %cst_22 : f32 to vector<8x128xf32>
    %22 = arith.mulf %21, %20 : vector<8x128xf32>
    %23 = arith.truncf %22 : vector<8x128xf32> to vector<8x128xbf16>
    %c0_23 = arith.constant 0 : index
    %c0_24 = arith.constant 0 : index
    %24 = vector.load %arg9[%c0_23, %c0_24] : memref<8x256xbf16, #tpu.memory_space<vmem>>, vector<8x128xbf16>
    tpu.vector_store %arg9[%c0_23, %c0_24], %23 {strides = array<i32>} : memref<8x256xbf16, #tpu.memory_space<vmem>>, vector<8x128xbf16>,
    %c0_25 = arith.constant 0 : index
    %c0_26 = arith.constant 0 : index
    %25 = vector.load %arg9[%c0_25, %c0_26] : memref<8x256xbf16, #tpu.memory_space<vmem>>, vector<8x128xbf16>
    %c0_27 = arith.constant 0 : index
    %c0_28 = arith.constant 0 : index
    %26 = vector.load %arg10[%c0_27, %c0_28] : memref<72x128xbf16, #tpu.memory_space<vmem>>, vector<8x128xbf16>
    tpu.vector_store %arg10[%c0_27, %c0_28], %25 {strides = array<i32>} : memref<72x128xbf16, #tpu.memory_space<vmem>>, vector<8x128xbf16>,
    %c0_29 = arith.constant 0 : index
    %c1_30 = arith.constant 1 : index
    %27 = vector.load %arg9[%c0_29, %c1_30] : memref<8x256xbf16, #tpu.memory_space<vmem>>, vector<8x128xbf16>
    %c8_31 = arith.constant 8 : index
    %c0_32 = arith.constant 0 : index
    %28 = vector.load %arg10[%c8_31, %c0_32] : memref<72x128xbf16, #tpu.memory_space<vmem>>, vector<8x128xbf16>
    tpu.vector_store %arg10[%c8_31, %c0_32], %27 {strides = array<i32>} : memref<72x128xbf16, #tpu.memory_space<vmem>>, vector<8x128xbf16>,
    %c0_33 = arith.constant 0 : index
    %c2_34 = arith.constant 2 : index
    %29 = vector.load %arg9[%c0_33, %c2_34] : memref<8x256xbf16, #tpu.memory_space<vmem>>, vector<8x128xbf16>
    %c16_35 = arith.constant 16 : index
    %c0_36 = arith.constant 0 : index
    %30 = vector.load %arg10[%c16_35, %c0_36] : memref<72x128xbf16, #tpu.memory_space<vmem>>, vector<8x128xbf16>
    tpu.vector_store %arg10[%c16_35, %c0_36], %29 {strides = array<i32>} : memref<72x128xbf16, #tpu.memory_space<vmem>>, vector<8x128xbf16>,
    %c0_37 = arith.constant 0 : index
    %c3 = arith.constant 3 : index
    %31 = vector.load %arg9[%c0_37, %c3] : memref<8x256xbf16, #tpu.memory_space<vmem>>, vector<8x128xbf16>
    %c24 = arith.constant 24 : index
    %c0_38 = arith.constant 0 : index
    %32 = vector.load %arg10[%c24, %c0_38] : memref<72x128xbf16, #tpu.memory_space<vmem>>, vector<8x128xbf16>
    tpu.vector_store %arg10[%c24, %c0_38], %31 {strides = array<i32>} : memref<72x128xbf16, #tpu.memory_space<vmem>>, vector<8x128xbf16>,
    %c0_39 = arith.constant 0 : index
    %c4 = arith.constant 4 : index
    %33 = vector.load %arg9[%c0_39, %c4] : memref<8x256xbf16, #tpu.memory_space<vmem>>, vector<8x128xbf16>
    %c32 = arith.constant 32 : index
    %c0_40 = arith.constant 0 : index
    %34 = vector.load %arg10[%c32, %c0_40] : memref<72x128xbf16, #tpu.memory_space<vmem>>, vector<8x128xbf16>
    tpu.vector_store %arg10[%c32, %c0_40], %33 {strides = array<i32>} : memref<72x128xbf16, #tpu.memory_space<vmem>>, vector<8x128xbf16>,
    %c0_41 = arith.constant 0 : index
    %c0_42 = arith.constant 0 : index
    %35 = vector.load %arg4[%c0_41, %c0_42] : memref<8x40xbf16, #tpu.memory_space<vmem>>, vector<8x40xbf16>
    %c0_43 = arith.constant 0 : index
    %c0_44 = arith.constant 0 : index
    %36 = vector.load %arg10[%c0_43, %c0_44] : memref<72x128xbf16, #tpu.memory_space<vmem>>, vector<40x128xbf16>
    %cst_45 = arith.constant dense<0.000000e+00> : vector<8x128xf32>
    %37 = tpu.matmul %35, %36, %cst_45 {dimension_numbers = #tpu.dot_dimension_numbers<[1], [0], [0], [1], [0, 0, 1, 1], [], []>} : vector<8x40xbf16>, vector<40x128xbf16>, vector<8x128xf32> -> vector<8x128xf32>
    %c0_46 = arith.constant 0 : index
    %c0_47 = arith.constant 0 : index
    %38 = vector.load %arg5[%c0_46, %c0_47] : memref<8x1xf32, #tpu.memory_space<vmem>>, vector<8x1xf32>
    %39 = vector.broadcast %38 : vector<8x1xf32> to vector<8x128xf32>
    %40 = arith.addf %37, %39 : vector<8x128xf32>
    %cst_48 = arith.constant 5.000000e-01 : f32
    %41 = vector.broadcast %cst_48 : f32 to vector<8x128xf32>
    %42 = arith.mulf %41, %40 : vector<8x128xf32>
    %43 = math.tanh %42 : vector<8x128xf32>
    %cst_49 = arith.constant 1.000000e+00 : f32
    %44 = vector.broadcast %cst_49 : f32 to vector<8x128xf32>
    %45 = arith.addf %44, %43 : vector<8x128xf32>
    %cst_50 = arith.constant 5.000000e-01 : f32
    %46 = vector.broadcast %cst_50 : f32 to vector<8x128xf32>
    %47 = arith.mulf %46, %45 : vector<8x128xf32>
    %48 = arith.truncf %47 : vector<8x128xf32> to vector<8x128xbf16>
    %c0_51 = arith.constant 0 : index
    %c0_52 = arith.constant 0 : index
    %49 = vector.load %arg9[%c0_51, %c0_52] : memref<8x256xbf16, #tpu.memory_space<vmem>>, vector<8x128xbf16>
    tpu.vector_store %arg9[%c0_51, %c0_52], %48 {strides = array<i32>} : memref<8x256xbf16, #tpu.memory_space<vmem>>, vector<8x128xbf16>,
    %c0_53 = arith.constant 0 : index
    %c0_54 = arith.constant 0 : index
    %50 = vector.load %arg9[%c0_53, %c0_54] : memref<8x256xbf16, #tpu.memory_space<vmem>>, vector<8x128xbf16>
    %c0_55 = arith.constant 0 : index
    %c0_56 = arith.constant 0 : index
    %51 = vector.load %arg10[%c0_55, %c0_56] : memref<72x128xbf16, #tpu.memory_space<vmem>>, vector<8x128xbf16>
    tpu.vector_store %arg10[%c0_55, %c0_56], %50 {strides = array<i32>} : memref<72x128xbf16, #tpu.memory_space<vmem>>, vector<8x128xbf16>,
    %c0_57 = arith.constant 0 : index
    %c1_58 = arith.constant 1 : index
    %52 = vector.load %arg9[%c0_57, %c1_58] : memref<8x256xbf16, #tpu.memory_space<vmem>>, vector<8x128xbf16>
    %c8_59 = arith.constant 8 : index
    %c0_60 = arith.constant 0 : index
    %53 = vector.load %arg10[%c8_59, %c0_60] : memref<72x128xbf16, #tpu.memory_space<vmem>>, vector<8x128xbf16>
    tpu.vector_store %arg10[%c8_59, %c0_60], %52 {strides = array<i32>} : memref<72x128xbf16, #tpu.memory_space<vmem>>, vector<8x128xbf16>,
    %c0_61 = arith.constant 0 : index
    %c2_62 = arith.constant 2 : index
    %54 = vector.load %arg9[%c0_61, %c2_62] : memref<8x256xbf16, #tpu.memory_space<vmem>>, vector<8x128xbf16>
    %c16_63 = arith.constant 16 : index
    %c0_64 = arith.constant 0 : index
    %55 = vector.load %arg10[%c16_63, %c0_64] : memref<72x128xbf16, #tpu.memory_space<vmem>>, vector<8x128xbf16>
    tpu.vector_store %arg10[%c16_63, %c0_64], %54 {strides = array<i32>} : memref<72x128xbf16, #tpu.memory_space<vmem>>, vector<8x128xbf16>,
    %c0_65 = arith.constant 0 : index
    %c3_66 = arith.constant 3 : index
    %56 = vector.load %arg9[%c0_65, %c3_66] : memref<8x256xbf16, #tpu.memory_space<vmem>>, vector<8x128xbf16>
    %c24_67 = arith.constant 24 : index
    %c0_68 = arith.constant 0 : index
    %57 = vector.load %arg10[%c24_67, %c0_68] : memref<72x128xbf16, #tpu.memory_space<vmem>>, vector<8x128xbf16>
    tpu.vector_store %arg10[%c24_67, %c0_68], %56 {strides = array<i32>} : memref<72x128xbf16, #tpu.memory_space<vmem>>, vector<8x128xbf16>,
    %c0_69 = arith.constant 0 : index
    %c4_70 = arith.constant 4 : index
    %58 = vector.load %arg9[%c0_69, %c4_70] : memref<8x256xbf16, #tpu.memory_space<vmem>>, vector<8x128xbf16>
    %c32_71 = arith.constant 32 : index
    %c0_72 = arith.constant 0 : index
    %59 = vector.load %arg10[%c32_71, %c0_72] : memref<72x128xbf16, #tpu.memory_space<vmem>>, vector<8x128xbf16>
    tpu.vector_store %arg10[%c32_71, %c0_72], %58 {strides = array<i32>} : memref<72x128xbf16, #tpu.memory_space<vmem>>, vector<8x128xbf16>,
    %c0_73 = arith.constant 0 : index
    %c5 = arith.constant 5 : index
    %60 = vector.load %arg9[%c0_73, %c5] : memref<8x256xbf16, #tpu.memory_space<vmem>>, vector<8x128xbf16>
    %c40 = arith.constant 40 : index
    %c0_74 = arith.constant 0 : index
    %61 = vector.load %arg10[%c40, %c0_74] : memref<72x128xbf16, #tpu.memory_space<vmem>>, vector<8x128xbf16>
    tpu.vector_store %arg10[%c40, %c0_74], %60 {strides = array<i32>} : memref<72x128xbf16, #tpu.memory_space<vmem>>, vector<8x128xbf16>,
    %c0_75 = arith.constant 0 : index
    %c6 = arith.constant 6 : index
    %62 = vector.load %arg9[%c0_75, %c6] : memref<8x256xbf16, #tpu.memory_space<vmem>>, vector<8x128xbf16>
    %c48 = arith.constant 48 : index
    %c0_76 = arith.constant 0 : index
    %63 = vector.load %arg10[%c48, %c0_76] : memref<72x128xbf16, #tpu.memory_space<vmem>>, vector<8x128xbf16>
    tpu.vector_store %arg10[%c48, %c0_76], %62 {strides = array<i32>} : memref<72x128xbf16, #tpu.memory_space<vmem>>, vector<8x128xbf16>,
    %c0_77 = arith.constant 0 : index
    %c7 = arith.constant 7 : index
    %64 = vector.load %arg9[%c0_77, %c7] : memref<8x256xbf16, #tpu.memory_space<vmem>>, vector<8x128xbf16>
    %c56 = arith.constant 56 : index
    %c0_78 = arith.constant 0 : index
    %65 = vector.load %arg10[%c56, %c0_78] : memref<72x128xbf16, #tpu.memory_space<vmem>>, vector<8x128xbf16>
    tpu.vector_store %arg10[%c56, %c0_78], %64 {strides = array<i32>} : memref<72x128xbf16, #tpu.memory_space<vmem>>, vector<8x128xbf16>,
    %c0_79 = arith.constant 0 : index
    %c8_80 = arith.constant 8 : index
    %66 = vector.load %arg9[%c0_79, %c8_80] : memref<8x256xbf16, #tpu.memory_space<vmem>>, vector<8x128xbf16>
    %c64 = arith.constant 64 : index
    %c0_81 = arith.constant 0 : index
    %67 = vector.load %arg10[%c64, %c0_81] : memref<72x128xbf16, #tpu.memory_space<vmem>>, vector<8x128xbf16>
    tpu.vector_store %arg10[%c64, %c0_81], %66 {strides = array<i32>} : memref<72x128xbf16, #tpu.memory_space<vmem>>, vector<8x128xbf16>,
    %c0_82 = arith.constant 0 : index
    %c0_83 = arith.constant 0 : index
    %68 = vector.load %arg6[%c0_82, %c0_83] : memref<8x72xbf16, #tpu.memory_space<vmem>>, vector<8x72xbf16>
    %c0_84 = arith.constant 0 : index
    %c0_85 = arith.constant 0 : index
    %69 = vector.load %arg10[%c0_84, %c0_85] : memref<72x128xbf16, #tpu.memory_space<vmem>>, vector<72x128xbf16>
    %cst_86 = arith.constant dense<0.000000e+00> : vector<8x128xf32>
    %70 = tpu.matmul %68, %69, %cst_86 {dimension_numbers = #tpu.dot_dimension_numbers<[1], [0], [0], [1], [0, 0, 1, 1], [], []>} : vector<8x72xbf16>, vector<72x128xbf16>, vector<8x128xf32> -> vector<8x128xf32>
    %c0_87 = arith.constant 0 : index
    %c0_88 = arith.constant 0 : index
    %71 = vector.load %arg7[%c0_87, %c0_88] : memref<8x1xf32, #tpu.memory_space<vmem>>, vector<8x1xf32>
    %72 = vector.broadcast %71 : vector<8x1xf32> to vector<8x128xf32>
    %73 = arith.addf %70, %72 : vector<8x128xf32>
    %cst_89 = arith.constant 5.000000e-01 : f32
    %74 = vector.broadcast %cst_89 : f32 to vector<8x128xf32>
    %75 = arith.mulf %74, %73 : vector<8x128xf32>
    %76 = math.tanh %75 : vector<8x128xf32>
    %cst_90 = arith.constant 1.000000e+00 : f32
    %77 = vector.broadcast %cst_90 : f32 to vector<8x128xf32>
    %78 = arith.addf %77, %76 : vector<8x128xf32>
    %cst_91 = arith.constant 5.000000e-01 : f32
    %79 = vector.broadcast %cst_91 : f32 to vector<8x128xf32>
    %80 = arith.mulf %79, %78 : vector<8x128xf32>
    %81 = vector.extract_strided_slice %80 {offsets = [0, 0], sizes = [3, 128], strides = [1, 1]} : vector<8x128xf32> to vector<3x128xf32>
    %c0_92 = arith.constant 0 : index
    %c0_93 = arith.constant 0 : index
    %82 = vector.load %arg8[%c0_92, %c0_93] : memref<3x128xf32, #tpu.memory_space<vmem>>, vector<3x128xf32>
    tpu.vector_store %arg8[%c0_92, %c0_93], %81 {strides = array<i32>} : memref<3x128xf32, #tpu.memory_space<vmem>>, vector<3x128xf32>,
    return
  }
  func.func @transform_0(%arg0: i32) -> (i32, i32) {
    %c0_i32 = arith.constant 0 : i32
    %c0_i32_0 = arith.constant 0 : i32
    return %c0_i32, %arg0 : i32, i32
  }
  func.func @transform_1(%arg0: i32) -> (i32, i32) {
    %c0_i32 = arith.constant 0 : i32
    %c0_i32_0 = arith.constant 0 : i32
    %c0_i32_1 = arith.constant 0 : i32
    return %c0_i32, %c0_i32_0 : i32, i32
  }
  func.func @transform_2(%arg0: i32) -> (i32, i32) {
    %c0_i32 = arith.constant 0 : i32
    %c0_i32_0 = arith.constant 0 : i32
    %c0_i32_1 = arith.constant 0 : i32
    return %c0_i32, %c0_i32_0 : i32, i32
  }
  func.func @transform_3(%arg0: i32) -> (i32, i32) {
    %c0_i32 = arith.constant 0 : i32
    %c0_i32_0 = arith.constant 0 : i32
    %c0_i32_1 = arith.constant 0 : i32
    return %c0_i32, %c0_i32_0 : i32, i32
  }
  func.func @transform_4(%arg0: i32) -> (i32, i32) {
    %c0_i32 = arith.constant 0 : i32
    %c0_i32_0 = arith.constant 0 : i32
    %c0_i32_1 = arith.constant 0 : i32
    return %c0_i32, %c0_i32_0 : i32, i32
  }
  func.func @transform_5(%arg0: i32) -> (i32, i32) {
    %c0_i32 = arith.constant 0 : i32
    %c0_i32_0 = arith.constant 0 : i32
    %c0_i32_1 = arith.constant 0 : i32
    return %c0_i32, %c0_i32_0 : i32, i32
  }
  func.func @transform_6(%arg0: i32) -> (i32, i32) {
    %c0_i32 = arith.constant 0 : i32
    %c0_i32_0 = arith.constant 0 : i32
    %c0_i32_1 = arith.constant 0 : i32
    return %c0_i32, %c0_i32_0 : i32, i32
  }
  func.func @transform_7(%arg0: i32) -> (i32, i32) {
    %c0_i32 = arith.constant 0 : i32
    %c0_i32_0 = arith.constant 0 : i32
    return %c0_i32, %arg0 : i32, i32
  }
}

</mosaic_0001>

<bundles_post_ra>
// kernel: tdnn_forward.1
= control target key start
LH: loop header
LB: loop body
LE: loop exit
PB: predicated region body
PF: predicated region fallthrough
CT: control target
= control target key end

     0   :  { %v495_v0 = vmov 0   ;;  %v496_v2 = vmov 0.0   ;;  %s497_s26 = smov 127   ;;  %s498_s27 = smov 126   ;;  %vm499_vm0 = vmmov 0   ;;  %vm37_vm1 = vcmask 1039360   ;;  %s609_s0 = inlined_call_operand.vmem [shape: bf16[4,128], index: 0, kind: input, shape index: {}]   ;;  %s610_s2 = inlined_call_operand.vmem [shape: f32[8,1], index: 2, kind: input, shape index: {}]   ;;  %s611_s1 = inlined_call_operand.vmem [shape: bf16[8,24], index: 1, kind: input, shape index: {}]   ;;  %s612_s4 = inlined_call_operand.vmem [shape: f32[8,1], index: 4, kind: input, shape index: {}]   ;;  %s613_s3 = inlined_call_operand.vmem [shape: bf16[8,40], index: 3, kind: input, shape index: {}]   ;;  %s614_s6 = inlined_call_operand.vmem [shape: f32[8,1], index: 6, kind: input, shape index: {}]   ;;  %s615_s5 = inlined_call_operand.vmem [shape: bf16[8,72], index: 5, kind: input, shape index: {}]   ;;  %s616_s7 = inlined_call_operand.vmem [shape: f32[3,128], index: 7, kind: output, shape index: {}]  }
   0x1   :  { %27 = vst [vmem:[#allocation2] sm:$0xff] %v495_v0  ;;  %v28_v1 = vld [vmem:[%s609_s0] sm:$0x3]  ;;  %477 = vset.pattern.permute.xlu1 %v495_v0  ;;  %478 = vset.pattern.permute.xlu0 %v495_v0  ;;  %vm46_vm2 = vcmask 1031168   ;;  %vm73_vm3 = vcmask 1043456   ;;  %vm69_vm4 = vcmask 195584  }
   0x2   :  { %29 = vst [vmem:[#allocation2] sm:$0x3] %v28_v1  ;;  %434 = vmatprep.subr.bf16.mxu1 %v496_v2  ;;  %452 = vmatprep.subr.bf16.mxu0 %v496_v2  ;;  %v54_v5 = vld [vmem:[%s610_s2] sm:$0xff]  ;;  %s501_s30 = smov 125   ;;  %vm155_vm5 = vcmask 1014784   ;;  %vm146_vm6 = vcmask 1022976  }
   0x3   :  { %438 = vmatprep.mubr.msk.bf16.mxu1 %vm499_vm0, %v496_v2  ;;  %462 = vmatprep.mubr.msk.bf16.mxu0 %vm499_vm0, %v496_v2  ;;  %v50_v15 = vld [vmem:[%s611_s1] sm:$0xf]  ;;  %s500_s1 = smov 124   ;;  %vm186_vm7 = vcmask 326656   ;;  %s503_s11 = smov 123   ;;  %vm287_vm8 = vcmask 998400  }
   0x4   :  { %57 = vperm.xlu1 %477, %v54_v5   ;;  %v165_v29 = vld [vmem:[%s612_s4] sm:$0xff]  ;;  %s504_s12 = smov 120   ;;  %s505_s13 = smov 121   ;;  %vm278_vm9 = vcmask 1006592   ;;  %vm305_vm10 = vcmask 982016   ;;  %vm296_vm11 = vcmask 990208  }
   0x5   :  { %v159_v46 = vld [vmem:[%s613_s3] sm:$0xf]  ;;  %s502_s3 = smov 122   ;;  %vm352_vm12 = vcmask 588800  }
   0x6   :  { %v319_v60 = vld [vmem:[%s614_s6] sm:$0xff] }
   0x9   :  { %v32_v3 = vld [vmem:[#allocation2] sm:$0xff] }
   0xa   :  { %v30_v4 = vld [vmem:[#allocation2] sm:$0xf]  ;;  %34 = vrot.lane.b32.xlu0 %v32_v3, %s497_s26 }
   0xb   :  { %31 = vst [vmem:[#allocation3] sm:$0xf] %v30_v4 }
   0xe   :  { %43 = vrot.lane.b32.xlu0 %v32_v3, %s498_s27 }
  0x7c   :  { %v35_v6 = vpop.permute.xlu0 %34 }
  0x7d   :  { %v36_v7 = vrot.slane %v35_v6, 4 }
  0x7f   :  { %v38_v8 = vsel %vm37_vm1, %v35_v6, %v36_v7 }
  0x80   :  { %40 = vst [vmem:[#allocation3 + $0x4] sm:$0xf] %v38_v8  ;;  %v44_v9 = vpop.permute.xlu0 %43 }
  0x81   :  { %v45_v10 = vrot.slane %v44_v9, 4 }
  0x83   :  { %v47_v11 = vsel %vm46_vm2, %v44_v9, %v45_v10  ;;  %v58_v16 = vpop.permute.xlu1 %57 }
  0x84   :  { %49 = vst [vmem:[#allocation3 + $0x8] sm:$0xf] %v47_v11 }
  0x87   :  { %v479_v12 = vld [vmem:[#allocation3] sm:$0xff]  }
  0x88   :  { %435 = vmatpush3.bf16.msra.mxu1 %v479_v12 }
  0x89   :  { %436 = vmatprep.subr.bf16.mxu1 %v496_v2 }
  0x8b   :  { %v480_v13 = vld [vmem:[#allocation3 + $0x8] ss:$0 sps:$4 sm:$0xff]  }
  0x8c   :  { %v75_v14 = vsel %vm73_vm3, %v480_v13, 0 }
  0x8d   :  { %437 = vmatpush3.bf16.msra.mxu1 %v75_v14 }
  0x8e   :  { %442 = vmatprep.subr.bf16.mxu1 %v496_v2 }
  0x90   :  { %439 = vmatmul.mubr.msk.bf16.vlgmr.msra.gmra.mrb[0].mxu1 %vm69_vm4, %v50_v15 }
  0x91   :  { %448 = vmatprep.mubr.msk.bf16.mxu1 %vm499_vm0, %v496_v2 }
 0x163   :  { %v111_v17 = vpop.f32.mrb[0].mxu1 }
 0x164   :  { %v112_v18 = vadd.f32 %v111_v17, %v58_v16  ;;  %v440_v19 = vpop.f32.mrb[1].mxu1 }
 0x165   :  { %v114_v20 = vpop.f32.mrb[2].mxu1 }
 0x166   :  { %v117_v21 = vmul.f32 0.5, %v112_v18  ;;  %v441_v22 = vpop.f32.mrb[3].mxu1 }
 0x168   :  { %489 = vtanh.f32 %v117_v21 }
 0x172   :  { %v490_v23 = vpop.eup %489 }
 0x173   :  { %v119_v24 = vadd.f32 1.0, %v490_v23 }
 0x175   :  { %v120_v25 = vmul.f32 0.5, %v119_v24 }
 0x177   :  { %v121_v26 = vpack.c.bf16 %v120_v25, %v120_v25 }
 0x179   :  { %122 = vst [vmem:[#allocation2] sm:$0xf] %v121_v26 }
 0x180   :  { %v133_v27 = vld [vmem:[#allocation2] sm:$0xff] }
 0x181   :  { %v123_v28 = vld [vmem:[#allocation2] sm:$0xf]  ;;  %135 = vrot.lane.b32.xlu0 %v133_v27, %s498_s27  ;;  %127 = vrot.lane.b32.xlu1 %v133_v27, %s497_s26 }
 0x182   :  { %124 = vst [vmem:[#allocation3] sm:$0xf] %v123_v28  ;;  %v309_v28 = vld [vmem:[%s615_s5] sm:$0xf] }
 0x185   :  { %152 = vrot.lane.b32.xlu0 %v133_v27, %s500_s1  ;;  %143 = vrot.lane.b32.xlu1 %v133_v27, %s501_s30 }
 0x189   :  { %168 = vperm.xlu1 %477, %v165_v29  }
 0x1f3   :  { %v136_v30 = vpop.permute.xlu0 %135  ;;  %v128_v31 = vpop.permute.xlu1 %127 }
 0x1f4   :  { %v137_v32 = vrot.slane %v136_v30, 4  ;;  %v129_v33 = vrot.slane %v128_v31, 4 }
 0x1f6   :  { %v138_v34 = vsel %vm46_vm2, %v136_v30, %v137_v32  ;;  %v130_v35 = vsel %vm37_vm1, %v128_v31, %v129_v33 }
 0x1f7   :  { %140 = vst [vmem:[#allocation3 + $0x8] sm:$0xf] %v138_v34  ;;  %132 = vst [vmem:[#allocation3 + $0x4] sm:$0xf] %v130_v35  ;;  %v153_v36 = vpop.permute.xlu0 %152  ;;  %v144_v37 = vpop.permute.xlu1 %143 }
 0x1f8   :  { %v154_v38 = vrot.slane %v153_v36, 4  ;;  %v145_v39 = vrot.slane %v144_v37, 4 }
 0x1fa   :  { %v156_v40 = vsel %vm155_vm5, %v153_v36, %v154_v38  ;;  %v147_v41 = vsel %vm146_vm6, %v144_v37, %v145_v39 }
 0x1fb   :  { %158 = vst [vmem:[#allocation3 + $0x10] sm:$0xf] %v156_v40  ;;  %149 = vst [vmem:[#allocation3 + $0xc] sm:$0xf] %v147_v41 }
 0x1fe   :  { %v481_v42 = vld [vmem:[#allocation3] sm:$0xff]  }
 0x1ff   :  { %443 = vmatpush3.bf16.msra.mxu1 %v481_v42 }
 0x200   :  { %444 = vmatprep.subr.bf16.mxu1 %v496_v2 }
 0x202   :  { %v482_v43 = vld [vmem:[#allocation3 + $0x8] sm:$0xff]   ;;  %v483_v44 = vld [vmem:[#allocation3 + $0x10] ss:$0 sps:$4 sm:$0xff]  }
 0x203   :  { %445 = vmatpush3.bf16.msra.mxu1 %v482_v43  ;;  %v191_v45 = vsel %vm73_vm3, %v483_v44, 0 }
 0x204   :  { %446 = vmatprep.subr.bf16.mxu1 %v496_v2 }
 0x207   :  { %447 = vmatpush3.bf16.msra.mxu1 %v191_v45 }
 0x208   :  { %v169_v47 = vpop.permute.xlu1 %168 }
 0x20a   :  { %449 = vmatmul.mubr.msk.bf16.vlgmr.msra.gmra.mrb[4].mxu1 %vm186_vm7, %v159_v46 }
 0x2dd   :  { %v227_v48 = vpop.f32.mrb[4].mxu1 }
 0x2de   :  { %v228_v49 = vadd.f32 %v227_v48, %v169_v47  ;;  %v450_v50 = vpop.f32.mrb[5].mxu1 }
 0x2df   :  { %v230_v51 = vpop.f32.mrb[6].mxu1 }
 0x2e0   :  { %v233_v52 = vmul.f32 0.5, %v228_v49  ;;  %v451_v53 = vpop.f32.mrb[7].mxu1 }
 0x2e2   :  { %491 = vtanh.f32 %v233_v52 }
 0x2ec   :  { %v492_v54 = vpop.eup %491 }
 0x2ed   :  { %v235_v55 = vadd.f32 1.0, %v492_v54 }
 0x2ef   :  { %v236_v56 = vmul.f32 0.5, %v235_v55 }
 0x2f1   :  { %v237_v57 = vpack.c.bf16 %v236_v56, %v236_v56 }
 0x2f3   :  { %238 = vst [vmem:[#allocation2] sm:$0xf] %v237_v57 }
 0x2fa   :  { %v249_v58 = vld [vmem:[#allocation2] sm:$0xff] }
 0x2fb   :  { %v239_v59 = vld [vmem:[#allocation2] sm:$0xf]  ;;  %251 = vrot.lane.b32.xlu1 %v249_v58, %s498_s27  ;;  %243 = vrot.lane.b32.xlu0 %v249_v58, %s497_s26 }
 0x2fc   :  { %240 = vst [vmem:[#allocation3] sm:$0xf] %v239_v59 }
 0x2ff   :  { %267 = vrot.lane.b32.xlu1 %v249_v58, %s500_s1  ;;  %259 = vrot.lane.b32.xlu0 %v249_v58, %s501_s30 }
 0x303   :  { %284 = vrot.lane.b32.xlu1 %v249_v58, %s502_s3  ;;  %275 = vrot.lane.b32.xlu0 %v249_v58, %s503_s11 }
 0x307   :  { %302 = vrot.lane.b32.xlu1 %v249_v58, %s504_s12  ;;  %293 = vrot.lane.b32.xlu0 %v249_v58, %s505_s13 }
 0x30b   :  { %322 = vperm.xlu0 %478, %v319_v60  }
 0x36d   :  { %v252_v61 = vpop.permute.xlu1 %251  ;;  %v244_v62 = vpop.permute.xlu0 %243 }
 0x36e   :  { %v253_v63 = vrot.slane %v252_v61, 4  ;;  %v245_v0 = vrot.slane %v244_v62, 4 }
 0x370   :  { %v254_v1 = vsel %vm46_vm2, %v252_v61, %v253_v63  ;;  %v246_v3 = vsel %vm37_vm1, %v244_v62, %v245_v0 }
 0x371   :  { %256 = vst [vmem:[#allocation3 + $0x8] sm:$0xf] %v254_v1  ;;  %248 = vst [vmem:[#allocation3 + $0x4] sm:$0xf] %v246_v3  ;;  %v268_v4 = vpop.permute.xlu1 %267  ;;  %v260_v5 = vpop.permute.xlu0 %259 }
 0x372   :  { %v269_v6 = vrot.slane %v268_v4, 4  ;;  %v261_v7 = vrot.slane %v260_v5, 4 }
 0x374   :  { %v270_v8 = vsel %vm155_vm5, %v268_v4, %v269_v6  ;;  %v262_v9 = vsel %vm146_vm6, %v260_v5, %v261_v7 }
 0x375   :  { %272 = vst [vmem:[#allocation3 + $0x10] sm:$0xf] %v270_v8  ;;  %264 = vst [vmem:[#allocation3 + $0xc] sm:$0xf] %v262_v9  ;;  %v285_v10 = vpop.permute.xlu1 %284  ;;  %v276_v11 = vpop.permute.xlu0 %275 }
 0x376   :  { %v286_v12 = vrot.slane %v285_v10, 4  ;;  %v277_v13 = vrot.slane %v276_v11, 4 }
 0x378   :  { %v288_v14 = vsel %vm287_vm8, %v285_v10, %v286_v12  ;;  %v279_v15 = vsel %vm278_vm9, %v276_v11, %v277_v13  ;;  %v484_v16 = vld [vmem:[#allocation3] sm:$0xff]  }
 0x379   :  { %290 = vst [vmem:[#allocation3 + $0x18] sm:$0xf] %v288_v14  ;;  %281 = vst [vmem:[#allocation3 + $0x14] sm:$0xf] %v279_v15  ;;  %v303_v17 = vpop.permute.xlu1 %302  ;;  %v294_v18 = vpop.permute.xlu0 %293  ;;  %453 = vmatpush3.bf16.msra.mxu0 %v484_v16 }
 0x37a   :  { %v304_v19 = vrot.slane %v303_v17, 4  ;;  %v295_v20 = vrot.slane %v294_v18, 4  ;;  %454 = vmatprep.subr.bf16.mxu0 %v496_v2 }
 0x37c   :  { %v306_v21 = vsel %vm305_vm10, %v303_v17, %v304_v19  ;;  %v297_v22 = vsel %vm296_vm11, %v294_v18, %v295_v20  ;;  %v485_v23 = vld [vmem:[#allocation3 + $0x8] sm:$0xff]  }
 0x37d   :  { %308 = vst [vmem:[#allocation3 + $0x20] sm:$0xf] %v306_v21  ;;  %299 = vst [vmem:[#allocation3 + $0x1c] sm:$0xf] %v297_v22  ;;  %455 = vmatpush3.bf16.msra.mxu0 %v485_v23 }
 0x37e   :  { %456 = vmatprep.subr.bf16.mxu0 %v496_v2 }
 0x380   :  { %v486_v24 = vld [vmem:[#allocation3 + $0x10] sm:$0xff]  }
 0x381   :  { %457 = vmatpush3.bf16.msra.mxu0 %v486_v24 }
 0x382   :  { %458 = vmatprep.subr.bf16.mxu0 %v496_v2 }
 0x384   :  { %v487_v25 = vld [vmem:[#allocation3 + $0x18] sm:$0xff]   ;;  %v488_v26 = vld [vmem:[#allocation3 + $0x20] ss:$0 sps:$4 sm:$0xff]  }
 0x385   :  { %459 = vmatpush3.bf16.msra.mxu0 %v487_v25  ;;  %v357_v27 = vsel %vm73_vm3, %v488_v26, 0 }
 0x386   :  { %460 = vmatprep.subr.bf16.mxu0 %v496_v2 }
 0x389   :  { %461 = vmatpush3.bf16.msra.mxu0 %v357_v27 }
 0x38a   :  { %v323_v29 = vpop.permute.xlu0 %322 }
 0x38c   :  { %463 = vmatmul.mubr.msk.bf16.vlgmr.msra.gmra.mrb[0].mxu0 %vm352_vm12, %v309_v28 }
 0x45f   :  { %v393_v30 = vpop.f32.mrb[0].mxu0 }
 0x460   :  { %v394_v31 = vadd.f32 %v393_v30, %v323_v29  ;;  %v464_v32 = vpop.f32.mrb[1].mxu0 }
 0x461   :  { %v396_v33 = vpop.f32.mrb[2].mxu0 }
 0x462   :  { %v399_v34 = vmul.f32 0.5, %v394_v31  ;;  %v465_v35 = vpop.f32.mrb[3].mxu0 }
 0x464   :  { %493 = vtanh.f32 %v399_v34 }
 0x46e   :  { %v494_v36 = vpop.eup %493 }
 0x46f   :  { %v401_v37 = vadd.f32 1.0, %v494_v36 }
 0x471   :  { %v402_v2 = vmul.f32 0.5, %v401_v37 }
 0x473   :  { %403 = vst [vmem:[%s616_s7] sm:$0x7] %v402_v2 }

</bundles_post_ra>
